<compile_context>
chip_gen: v6e
topology: v6e:2x2x1
jax: 0.10.0
libtpu: 0.0.40
codegen_flags: <defaults>
</compile_context>

<pallas_src>
import jax
import jax.numpy as jnp
from jax.experimental import pallas as pl
from jax.experimental.pallas import tpu as pltpu

LANE = 128      # TPU lane width (last dim)
SUBLANE = 8     # f32 sublane width (second-to-last dim)


def _round_up(n, m):
    return ((n + m - 1) // m) * m


def worker_kernel(x_ref, w1_ref, b1_ref, w2_ref, b2_ref, out_ref):
    """Fused actor/critic MLP: one layer-1 matmul, one block-diag layer-2 matmul."""
    x = x_ref[...]                                                   # [bB, D]
    # layer 1 (both heads at once): [bB, D] @ [D, H_pad], f32 accumulate, bias+ReLU
    h = jnp.dot(x, w1_ref[...], preferred_element_type=jnp.float32) + b1_ref[...]
    h = jnp.maximum(h, 0.0).astype(w2_ref.dtype)                     # [bB, H_pad]
    # layer 2 (block-diagonal): [bB, H_pad] @ [H_pad, OUT_PAD] -> lane-dense slab
    out_ref[...] = (jnp.dot(h, w2_ref[...], preferred_element_type=jnp.float32)
                    + b2_ref[...]).astype(out_ref.dtype)             # [bB, OUT_PAD]


def pack_params(params, action_size, *, dtype=jnp.float32):
    """One-time (wrapper-side) packing of the two heads into fused, lane-padded weights.

    Call this ONCE outside the per-step jit so the .at[].set packing isn't
    re-materialized every call.  `dtype` controls the matmul-input dtype
    (f32 or bf16); biases stay f32 since they are added post f32-accumulation.
    """
    (w1p, b1p, w2p, b2p, w1c, b1c, w2c, b2c) = params
    D, H = w1p.shape
    A = action_size
    out_pad = _round_up(A + 1, LANE)          # lane-dense output width
    h_pad = _round_up(2 * H, LANE)            # lane-dense fused hidden width

    # layer 1: concat both heads along output axis, zero-pad to h_pad lanes.
    # ReLU(0*x + 0) = 0 and the matching w2 rows are zero, so padding is exact.
    w1_cat = jnp.zeros((D, h_pad), jnp.float32)
    w1_cat = w1_cat.at[:, :H].set(w1p).at[:, H:2 * H].set(w1c)
    b1_cat = jnp.zeros((1, h_pad), jnp.float32)
    b1_cat = b1_cat.at[:, :H].set(b1p).at[:, H:2 * H].set(b1c)

    # layer 2: block-diagonal [h_pad, out_pad]; policy in [:H, :A], critic in [H:2H, A]
    w2_cat = jnp.zeros((h_pad, out_pad), jnp.float32)
    w2_cat = w2_cat.at[:H, :A].set(w2p).at[H:2 * H, A:A + 1].set(w2c)
    b2_cat = jnp.zeros((1, out_pad), jnp.float32)
    b2_cat = b2_cat.at[:, :A].set(b2p).at[:, A:A + 1].set(b2c)

    return (w1_cat.astype(dtype), b1_cat, w2_cat.astype(dtype), b2_cat, out_pad)


def _choose_tiling(B, *, max_block_b=1024, sublane=SUBLANE, min_split_rows=512):
    """Pick (block_b, B_pad, num_tiles).

    Goals (memory-bound kernel):
      * big tiles (<= max_block_b) amortize the ~0.35us/step overhead,
      * pad waste <= (sublane-1) rows per tile instead of a full tile,
      * >=2 grid steps for large batches so v7x's two TensorCores both engage.
    """
    B_al = _round_up(B, sublane)
    num_tiles = -(-B_al // max_block_b)                 # ceil
    if num_tiles == 1 and B_al >= min_split_rows:
        num_tiles = 2                                   # engage both v7x TCs
    block_b = _round_up(-(-B_al // num_tiles), sublane)
    B_pad = num_tiles * block_b
    return block_b, B_pad, num_tiles


def worker_forward(x, packed, action_size, *, max_block_b=1024):
    """Fused actor/critic forward. x: [B, D] -> (logits [B, A] f32, value [B, 1] f32)."""
    w1_cat, b1_cat, w2_cat, b2_cat, out_pad = packed
    B, D = x.shape
    A = action_size

    io_dtype = w1_cat.dtype
    x = x.astype(io_dtype)
    # bf16 packs 2 rows per sublane -> keep batch tiles 16-row aligned in that case.
    sublane = SUBLANE if io_dtype == jnp.float32 else 2 * SUBLANE

    block_b, B_pad, num_tiles = _choose_tiling(
        B, max_block_b=max_block_b, sublane=sublane)
    if B_pad != B:
        x = jnp.pad(x, ((0, B_pad - B), (0, 0)))

    # Whole-array, grid-invariant blocks for weights/biases (stay VMEM-resident).
    def whole(arr):
        return pl.BlockSpec(arr.shape, lambda i: (0, 0))

    # VMEM footprint per tile (double-buffered): block_b*(D + out_pad)*bytes
    # -> ~1.5 MiB at block_b=1024, D=64, f32: far under every generation's
    # scoped default (incl. v7x), so no vmem_limit_bytes override needed.
    out = pl.pallas_call(
        worker_kernel,
        out_shape=jax.ShapeDtypeStruct((B_pad, out_pad), jnp.float32),
        grid=(num_tiles,),
        in_specs=[pl.BlockSpec((block_b, D), lambda i: (i, 0)),
                  whole(w1_cat), whole(b1_cat), whole(w2_cat), whole(b2_cat)],
        out_specs=pl.BlockSpec((block_b, out_pad), lambda i: (i, 0)),
        compiler_params=pltpu.CompilerParams(
            dimension_semantics=("parallel",)),   # batch tiles shard across TCs (v7x)
    )(x, w1_cat, b1_cat, w2_cat, b2_cat)

    # Padded rows of `out` hold garbage (ReLU(b1)@w2+b2); never expose them.
    logits = out[:B, :A]
    value = out[:B, A:A + 1]
    return logits, value


def init_params(key, state_dim, hidden, action_size):
    """Deterministic synthetic parameter init (nn.Linear-style uniform)."""
    ks = jax.random.split(key, 8)

    def lin(kw, kb, fan_in, fan_out):
        bound = 1.0 / jnp.sqrt(fan_in)
        w = jax.random.uniform(kw, (fan_in, fan_out), jnp.float32, -bound, bound)
        b = jax.random.uniform(kb, (1, fan_out), jnp.float32, -bound, bound)
        return w, b

    w1p, b1p = lin(ks[0], ks[1], state_dim, hidden)
    w2p, b2p = lin(ks[2], ks[3], hidden, action_size)
    w1c, b1c = lin(ks[4], ks[5], state_dim, hidden)
    w2c, b2c = lin(ks[6], ks[7], hidden, 1)
    return (w1p, b1p, w2p, b2p, w1c, b1c, w2c, b2c)


def reference_forward(x, params):
    (w1p, b1p, w2p, b2p, w1c, b1c, w2c, b2c) = params
    hp = jnp.maximum(x @ w1p + b1p, 0.0)
    logits = hp @ w2p + b2p
    hc = jnp.maximum(x @ w1c + b1c, 0.0)
    value = hc @ w2c + b2c
    return logits, value


if __name__ == "__main__":
    # Small shapes consistent with a Hearts PPO worker:
    #   state_dim=64 features, hidden=32, 52 actions (cards).
    B, D, H, A = 4, 64, 32, 52

    key = jax.random.PRNGKey(0)
    kx, kp, kx2 = jax.random.split(key, 3)
    params = init_params(kp, D, H, A)
    packed = pack_params(params, A)              # packed once, outside any jit

    # --- tiny inference batch (single-tile path; launch-overhead dominated) ---
    x = jax.random.normal(kx, (B, D), dtype=jnp.float32)
    logits, value = jax.block_until_ready(worker_forward(x, packed, A))
    ref_logits, ref_value = reference_forward(x, params)
    assert logits.shape == (B, A) and value.shape == (B, 1)
    assert jnp.allclose(logits, ref_logits, atol=1e-4, rtol=1e-4)
    assert jnp.allclose(value, ref_value, atol=1e-4, rtol=1e-4)

    # --- rollout-sized batch: exercises low-pad-waste tiling + 2 parallel tiles ---
    B2 = 600                                     # -> 2 tiles of 304 rows, 8 pad rows total
    x2 = jax.random.normal(kx2, (B2, D), dtype=jnp.float32)
    logits2, value2 = jax.block_until_ready(worker_forward(x2, packed, A))
    ref_logits2, ref_value2 = reference_forward(x2, params)
    assert logits2.shape == (B2, A) and value2.shape == (B2, 1)
    assert jnp.allclose(logits2, ref_logits2, atol=1e-4, rtol=1e-4)
    assert jnp.allclose(value2, ref_value2, atol=1e-4, rtol=1e-4)

    # --- optional bf16 I/O path (halves dominant HBM traffic on v6e/v7x) ---
    packed_bf16 = pack_params(params, A, dtype=jnp.bfloat16)
    logits_bf, value_bf = jax.block_until_ready(worker_forward(x2, packed_bf16, A))
    assert jnp.allclose(logits_bf, ref_logits2, atol=1e-1, rtol=1e-1)
    assert jnp.allclose(value_bf, ref_value2, atol=1e-1, rtol=1e-1)

    # TODO(synk): Worker.get_action / memory / callback logic (sampling, masking,
    # rollout storage) is host-side control flow, not part of forward(); only the
    # forward pass is implemented as a kernel.
    print("KERNEL_OK")
</pallas_src>

<mosaic_0001>
module attributes {stable_mosaic.version = 11 : i64} {
  func.func @worker_kernel(%arg0: i32, %arg1: memref<8x64xf32, #tpu.memory_space<vmem>>, %arg2: memref<64x128xf32, #tpu.memory_space<vmem>>, %arg3: memref<1x128xf32, #tpu.memory_space<vmem>>, %arg4: memref<128x128xf32, #tpu.memory_space<vmem>>, %arg5: memref<1x128xf32, #tpu.memory_space<vmem>>, %arg6: memref<8x128xf32, #tpu.memory_space<vmem>>) attributes {dimension_semantics = [#tpu.dimension_semantics<parallel>], iteration_bounds = array<i64: 1>, scalar_prefetch = 0 : i64, scratch_operands = 0 : i64, tpu.core_type = #tpu.core_type<tc>, window_params = [{transform_indices = @transform_0, window_bounds = array<i64: 8, 64>}, {pipeline_mode = #tpu.pipeline_mode<synchronous>, transform_indices = @transform_1, window_bounds = array<i64: 64, 128>}, {pipeline_mode = #tpu.pipeline_mode<synchronous>, transform_indices = @transform_2, window_bounds = array<i64: 1, 128>}, {pipeline_mode = #tpu.pipeline_mode<synchronous>, transform_indices = @transform_3, window_bounds = array<i64: 128, 128>}, {pipeline_mode = #tpu.pipeline_mode<synchronous>, transform_indices = @transform_4, window_bounds = array<i64: 1, 128>}, {transform_indices = @transform_5, window_bounds = array<i64: 8, 128>}]} {
    %c0 = arith.constant 0 : index
    %c0_0 = arith.constant 0 : index
    %0 = vector.load %arg1[%c0, %c0_0] : memref<8x64xf32, #tpu.memory_space<vmem>>, vector<8x64xf32>
    %c0_1 = arith.constant 0 : index
    %c0_2 = arith.constant 0 : index
    %1 = vector.load %arg2[%c0_1, %c0_2] : memref<64x128xf32, #tpu.memory_space<vmem>>, vector<64x128xf32>
    %cst = arith.constant dense<0.000000e+00> : vector<8x128xf32>
    %2 = tpu.matmul %0, %1, %cst {dimension_numbers = #tpu.dot_dimension_numbers<[1], [0], [0], [1], [0, 0, 1, 1], [], []>} : vector<8x64xf32>, vector<64x128xf32>, vector<8x128xf32> -> vector<8x128xf32>
    %c0_3 = arith.constant 0 : index
    %c0_4 = arith.constant 0 : index
    %3 = vector.load %arg3[%c0_3, %c0_4] : memref<1x128xf32, #tpu.memory_space<vmem>>, vector<1x128xf32>
    %4 = vector.broadcast %3 : vector<1x128xf32> to vector<8x128xf32>
    %5 = arith.addf %2, %4 : vector<8x128xf32>
    %cst_5 = arith.constant 0.000000e+00 : f32
    %6 = vector.broadcast %cst_5 : f32 to vector<8x128xf32>
    %7 = arith.maximumf %5, %6 : vector<8x128xf32>
    %c0_6 = arith.constant 0 : index
    %c0_7 = arith.constant 0 : index
    %8 = vector.load %arg4[%c0_6, %c0_7] : memref<128x128xf32, #tpu.memory_space<vmem>>, vector<128x128xf32>
    %cst_8 = arith.constant dense<0.000000e+00> : vector<8x128xf32>
    %9 = tpu.matmul %7, %8, %cst_8 {dimension_numbers = #tpu.dot_dimension_numbers<[1], [0], [0], [1], [0, 0, 1, 1], [], []>} : vector<8x128xf32>, vector<128x128xf32>, vector<8x128xf32> -> vector<8x128xf32>
    %c0_9 = arith.constant 0 : index
    %c0_10 = arith.constant 0 : index
    %10 = vector.load %arg5[%c0_9, %c0_10] : memref<1x128xf32, #tpu.memory_space<vmem>>, vector<1x128xf32>
    %11 = vector.broadcast %10 : vector<1x128xf32> to vector<8x128xf32>
    %12 = arith.addf %9, %11 : vector<8x128xf32>
    %c0_11 = arith.constant 0 : index
    %c0_12 = arith.constant 0 : index
    %13 = vector.load %arg6[%c0_11, %c0_12] : memref<8x128xf32, #tpu.memory_space<vmem>>, vector<8x128xf32>
    tpu.vector_store %arg6[%c0_11, %c0_12], %12 {strides = array<i32>} : memref<8x128xf32, #tpu.memory_space<vmem>>, vector<8x128xf32>,
    return
  }
  func.func @transform_0(%arg0: i32) -> (i32, i32) {
    %c0_i32 = arith.constant 0 : i32
    %c0_i32_0 = arith.constant 0 : i32
    return %arg0, %c0_i32 : i32, i32
  }
  func.func @transform_1(%arg0: i32) -> (i32, i32) {
    %c0_i32 = arith.constant 0 : i32
    %c0_i32_0 = arith.constant 0 : i32
    %c0_i32_1 = arith.constant 0 : i32
    return %c0_i32, %c0_i32_0 : i32, i32
  }
  func.func @transform_2(%arg0: i32) -> (i32, i32) {
    %c0_i32 = arith.constant 0 : i32
    %c0_i32_0 = arith.constant 0 : i32
    %c0_i32_1 = arith.constant 0 : i32
    return %c0_i32, %c0_i32_0 : i32, i32
  }
  func.func @transform_3(%arg0: i32) -> (i32, i32) {
    %c0_i32 = arith.constant 0 : i32
    %c0_i32_0 = arith.constant 0 : i32
    %c0_i32_1 = arith.constant 0 : i32
    return %c0_i32, %c0_i32_0 : i32, i32
  }
  func.func @transform_4(%arg0: i32) -> (i32, i32) {
    %c0_i32 = arith.constant 0 : i32
    %c0_i32_0 = arith.constant 0 : i32
    %c0_i32_1 = arith.constant 0 : i32
    return %c0_i32, %c0_i32_0 : i32, i32
  }
  func.func @transform_5(%arg0: i32) -> (i32, i32) {
    %c0_i32 = arith.constant 0 : i32
    %c0_i32_0 = arith.constant 0 : i32
    return %arg0, %c0_i32 : i32, i32
  }
}

</mosaic_0001>

<bundles_post_ra>
// kernel: tpu_custom_call.1
= control target key start
LH: loop header
LB: loop body
LE: loop exit
PB: predicated region body
PF: predicated region fallthrough
CT: control target
= control target key end

     0   :  { %10 = vsyncpa [#allocation3], 0  ;;  %s520_s0 = inlined_call_operand.hbm [shape: f32[8,64], index: 0, kind: input, shape index: {}]   ;;  %s521_s1 = inlined_call_operand.hbm [shape: f32[64,128], index: 1, kind: input, shape index: {}]   ;;  %s522_s2 = inlined_call_operand.vmem [shape: f32[1,128], index: 2, kind: input, shape index: {}]   ;;  %s523_s3 = inlined_call_operand.hbm [shape: f32[128,128], index: 3, kind: input, shape index: {}]   ;;  %s524_s4 = inlined_call_operand.vmem [shape: f32[1,128], index: 4, kind: input, shape index: {}]   ;;  %s525_s5 = inlined_call_operand.hbm [shape: f32[8,128], index: 5, kind: output, shape index: {}]  }
   0x1   :  { %11 = vsyncpa [#allocation6], 0 }
   0x2   :  { %12 = vsyncpa [#allocation4], 0  ;;  %s438_s18 = smov [#allocation5]  }
   0x3   :  { %s28_s19 = sshll.u32 %s438_s18, 4  ;;  %s29_s19 = int_to_ptr.vmem [resolvable:$true] %s28_s19 }
   0x4   :  { %s360_s20 = scalar_lea.vmem %s29_s19, 1024  ;;  %p365_p1 = scmp.lt.s32.totalorder %s29_s19, %s29_s19 }
   0x5   :  { %p361_p0 = scmp.ne.s32.totalorder %s29_s19, %s360_s20  ;;  %p366_p2 = scmp.lt.s32.totalorder %s360_s20, %s360_s20 }
   0x7   :  { %p367_p3 = por %p366_p2, %p365_p1 }
   0x9   :  { %p368_p4 = pnand %p367_p3, %p361_p0 }
   0xb   :  { %371 = shalt.err (!%p368_p4)
}
   0xc   :  { %s439_s21 = smov 128   ;;  %s440_s22 = smov 8  }
   0xd   :  { %34 = dma.hbm_to_vmem [thread:$0]  %s521_s1, 1024, %s29_s19, [#allocation6], %s439_s21, %s439_s21, %s440_s22  }
   0xe   :  { %s441_s25 = smov [#allocation2]   ;;  %s442_s27 = smov [#allocation7]  }
   0xf   :  { %s19_s26 = sshll.u32 %s441_s25, 4  ;;  %s42_s28 = sshll.u32 %s442_s27, 4  ;;  %s20_s26 = int_to_ptr.vmem [resolvable:$true] %s19_s26  ;;  %s43_s28 = int_to_ptr.vmem [resolvable:$true] %s42_s28 }
  0x10   :  { %s380_s29 = scalar_lea.vmem %s20_s26, 128  ;;  %p385_p6 = scmp.lt.s32.totalorder %s20_s26, %s20_s26 }
  0x11   :  { %p381_p5 = scmp.ne.s32.totalorder %s20_s26, %s380_s29  ;;  %p386_p7 = scmp.lt.s32.totalorder %s380_s29, %s380_s29 }
  0x13   :  { %p387_p8 = por %p386_p7, %p385_p6 }
  0x15   :  { %p388_p9 = pnand %p387_p8, %p381_p5 }
  0x17   :  { %391 = shalt.err (!%p388_p9)
}
  0x18   :  { %22 = dma.hbm_to_vmem [thread:$0]  %s520_s0, 128, %s20_s26, [#allocation3]  }
  0x19   :  { %s400_s7 = scalar_lea.vmem %s43_s28, 2048  ;;  %p405_p11 = scmp.lt.s32.totalorder %s43_s28, %s43_s28 }
  0x1a   :  { %p401_p10 = scmp.ne.s32.totalorder %s43_s28, %s400_s7  ;;  %p406_p12 = scmp.lt.s32.totalorder %s400_s7, %s400_s7 }
  0x1c   :  { %p407_p13 = por %p406_p12, %p405_p11 }
  0x1e   :  { %p408_p0 = pnand %p407_p13, %p401_p10 }
  0x20   :  { %411 = shalt.err (!%p408_p0)
}
  0x21   :  { %48 = dma.hbm_to_vmem [thread:$0]  %s523_s3, 2048, %s43_s28, [#allocation6], %s439_s21, %s439_s21, %s440_s22  }
  0x22   :  { %432 = dma.done.wait [#allocation3], 128  }
  0x23   :  { %433 = vsyncadd [#allocation3], 4294967168 }
  0x24   :  { %434 = dma.done.wait [#allocation6], 3072  }
  0x25   :  { %435 = vsyncadd [#allocation6], 4294964224  ;;  %v443_v0 = vmov 0.0   ;;  %vm444_vm0 = vmmov 0   ;;  %v68_v1 = vld [vmem:[#allocation5 + $0x38] sm:$0xff]  ;;  %v67_v2 = vld [vmem:[#allocation5 + $0x30] sm:$0xff] }
  0x26   :  { %290 = vmatprep.subr.mxu0 %v443_v0  ;;  %306 = vmatprep.mubr.msk.f32.mxu0 %vm444_vm0, %v443_v0  ;;  %v66_v3 = vld [vmem:[#allocation5 + $0x28] sm:$0xff]  ;;  %v166_v4 = vld [vmem:[#allocation7 + $0x78] sm:$0xff]  ;;  %v165_v5 = vld [vmem:[#allocation7 + $0x70] sm:$0xff]  ;;  %vm76_vm1 = vcmask 523264   ;;  %s445_s11 = smov [#allocation8]  }
  0x27   :  { %309 = vmatprep.subr.mxu1 %v443_v0  ;;  %341 = vmatprep.mubr.msk.f32.mxu1 %vm444_vm0, %v443_v0  ;;  %v65_v6 = vld [vmem:[#allocation5 + $0x20] sm:$0xff]  ;;  %v164_v7 = vld [vmem:[#allocation7 + $0x68] sm:$0xff]  ;;  %v64_v8 = vld [vmem:[#allocation5 + $0x18] sm:$0xff]  ;;  %s251_s12 = sshll.u32 %s445_s11, 4  ;;  %s252_s12 = int_to_ptr.vmem [resolvable:$true] %s251_s12 }
  0x28   :  { %291 = vmatpush3.msra.mxu0 %v68_v1  ;;  %310 = vmatpush3.msra.mxu1 %v166_v4  ;;  %v163_v9 = vld [vmem:[#allocation7 + $0x60] sm:$0xff]  ;;  %v63_v10 = vld [vmem:[#allocation5 + $0x10] sm:$0xff]  ;;  %v162_v11 = vld [vmem:[#allocation7 + $0x58] sm:$0xff]  ;;  %s412_s13 = scalar_lea.vmem %s252_s12, 128  ;;  %p417_p2 = scmp.lt.s32.totalorder %s252_s12, %s252_s12 }
  0x29   :  { %292 = vmatprep.subr.mxu0 %v443_v0  ;;  %311 = vmatprep.subr.mxu1 %v443_v0  ;;  %v62_v12 = vld [vmem:[#allocation5 + $0x8] sm:$0xff]  ;;  %v161_v13 = vld [vmem:[#allocation7 + $0x50] sm:$0xff]  ;;  %v61_v14 = vld [vmem:[#allocation5] sm:$0xff]  ;;  %p413_p1 = scmp.ne.s32.totalorder %s252_s12, %s412_s13  ;;  %p418_p3 = scmp.lt.s32.totalorder %s412_s13, %s412_s13 }
  0x2a   :  { %293 = vmatpush3.msra.mxu0 %v67_v2  ;;  %312 = vmatpush3.msra.mxu1 %v165_v5  ;;  %v60_v15 = vld [vmem:[#allocation2] sm:$0xff]  ;;  %v160_v16 = vld [vmem:[#allocation7 + $0x48] sm:$0xff]  ;;  %v159_v17 = vld [vmem:[#allocation7 + $0x40] sm:$0xff] }
  0x2b   :  { %294 = vmatprep.subr.mxu0 %v443_v0  ;;  %313 = vmatprep.subr.mxu1 %v443_v0  ;;  %v158_v18 = vld [vmem:[#allocation7 + $0x38] sm:$0xff]  ;;  %v157_v19 = vld [vmem:[#allocation7 + $0x30] sm:$0xff]  ;;  %v156_v20 = vld [vmem:[#allocation7 + $0x28] sm:$0xff]  ;;  %p419_p4 = por %p418_p3, %p417_p2 }
  0x2c   :  { %295 = vmatpush3.msra.mxu0 %v66_v3  ;;  %314 = vmatpush3.msra.mxu1 %v164_v7  ;;  %v155_v21 = vld [vmem:[#allocation7 + $0x20] sm:$0xff]  ;;  %v154_v22 = vld [vmem:[#allocation7 + $0x18] sm:$0xff]  ;;  %v153_v23 = vld [vmem:[#allocation7 + $0x10] sm:$0xff] }
  0x2d   :  { %296 = vmatprep.subr.mxu0 %v443_v0  ;;  %315 = vmatprep.subr.mxu1 %v443_v0  ;;  %v152_v24 = vld [vmem:[#allocation7 + $0x8] sm:$0xff]  ;;  %v151_v25 = vld [vmem:[#allocation7] sm:$0xff]  ;;  %v261_v26 = vld [vmem:[%s522_s2] ss:$0 sm:$0xff]  ;;  %p420_p5 = pnand %p419_p4, %p413_p1 }
  0x2e   :  { %297 = vmatpush3.msra.mxu0 %v65_v6  ;;  %316 = vmatpush3.msra.mxu1 %v163_v9  ;;  %v263_v31 = vld [vmem:[%s524_s4] ss:$0 sm:$0xff] }
  0x2f   :  { %298 = vmatprep.subr.mxu0 %v443_v0  ;;  %317 = vmatprep.subr.mxu1 %v443_v0 }
  0x30   :  { %299 = vmatpush3.msra.mxu0 %v64_v8  ;;  %318 = vmatpush3.msra.mxu1 %v162_v11 }
  0x31   :  { %300 = vmatprep.subr.mxu0 %v443_v0  ;;  %319 = vmatprep.subr.mxu1 %v443_v0 }
  0x32   :  { %301 = vmatpush3.msra.mxu0 %v63_v10  ;;  %320 = vmatpush3.msra.mxu1 %v161_v13 }
  0x33   :  { %302 = vmatprep.subr.mxu0 %v443_v0  ;;  %321 = vmatprep.subr.mxu1 %v443_v0 }
  0x34   :  { %303 = vmatpush3.msra.mxu0 %v62_v12  ;;  %322 = vmatpush3.msra.mxu1 %v160_v16 }
  0x35   :  { %304 = vmatprep.subr.mxu0 %v443_v0  ;;  %323 = vmatprep.subr.mxu1 %v443_v0 }
  0x36   :  { %305 = vmatpush3.msra.mxu0 %v61_v14  ;;  %324 = vmatpush3.msra.mxu1 %v159_v17 }
  0x37   :  { %307 = vmatmul.mubr.msk.f32.vlgmr.msra.gmra.mxu0 %vm76_vm1, %v60_v15  ;;  %325 = vmatprep.subr.mxu1 %v443_v0 }
  0x38   :  { %326 = vmatpush3.msra.mxu1 %v158_v18 }
  0x39   :  { %327 = vmatprep.subr.mxu1 %v443_v0 }
  0x3a   :  { %328 = vmatpush3.msra.mxu1 %v157_v19 }
  0x3b   :  { %329 = vmatprep.subr.mxu1 %v443_v0 }
  0x3c   :  { %330 = vmatpush3.msra.mxu1 %v156_v20 }
  0x3d   :  { %331 = vmatprep.subr.mxu1 %v443_v0 }
  0x3e   :  { %332 = vmatpush3.msra.mxu1 %v155_v21 }
  0x3f   :  { %333 = vmatprep.subr.mxu1 %v443_v0 }
  0x40   :  { %334 = vmatpush3.msra.mxu1 %v154_v22 }
  0x41   :  { %335 = vmatprep.subr.mxu1 %v443_v0 }
  0x42   :  { %336 = vmatpush3.msra.mxu1 %v153_v23 }
  0x43   :  { %337 = vmatprep.subr.mxu1 %v443_v0 }
  0x44   :  { %338 = vmatpush3.msra.mxu1 %v152_v24 }
  0x45   :  { %339 = vmatprep.subr.mxu1 %v443_v0 }
  0x46   :  { %340 = vmatpush3.msra.mxu1 %v151_v25 }
  0xf7   :  { %v146_v27 = vpop.f32.mrf.mxu0 }
  0xf8   :  { %v147_v28 = vadd.f32 %v261_v26, %v146_v27 }
  0xf9   :  { %v308_v29 = vpop.f32.mrf.mxu0 }
  0xfa   :  { %v150_v30 = vmax.f32 %v147_v28, 0.0 }
  0xfc   :  { %342 = vmatmul.mubr.f32.vlgmr.msra.gmra.mxu1 %v150_v30 }
 0x1bc   :  { %v240_v32 = vpop.f32.mrf.mxu1 }
 0x1bd   :  { %v241_v33 = vadd.f32 %v263_v31, %v240_v32 }
 0x1be   :  { %v343_v34 = vpop.f32.mrf.mxu1 }
 0x1bf   :  { %244 = vst [vmem:[#allocation8] sm:$0xff] %v241_v33 }
 0x1c0   :  { %423 = shalt.err (!%p420_p5)
}
 0x1c1   :  { %254 = dma.vmem_to_hbm [thread:$0]  %s252_s12, 128, %s525_s5, [#allocation4]  }
 0x1c2   :  { %436 = dma.done.wait [#allocation4], 128  }
 0x1c3   :  { %437 = vsyncadd [#allocation4], 4294967168 }
 0x1c4   :  { %258 = vsyncpa [#allocation3], 1 }
 0x1c5   :  { %259 = vsyncpa [#allocation6], 1 }
 0x1c6   :  { %260 = vsyncpa [#allocation4], 1 }

</bundles_post_ra>
